<compile_context>
chip_gen: v7x
topology: tpu7x:2x2x1
jax: 0.10.0
libtpu: 0.0.40
codegen_flags: <defaults>
</compile_context>

<pallas_src>
import functools

import jax
import jax.numpy as jnp
from jax.experimental import pallas as pl
from jax.experimental.pallas import tpu as pltpu


# Default batch tile: 10 * 8192 * 4B = 320 KiB per x tile (double-buffered),
# large enough to amortize per-step overhead on v5e/v6e/v7x, tiny vs VMEM.
DEFAULT_TILE_B = 8192
# Below this batch size, plain fused XLA beats any Pallas kernel launch.
MIN_PALLAS_BATCH = 1024


def mlp_kernel_t(xT_ref, w1_ref, b1_ref, w2_ref, b2_ref, oT_ref):
    """Feature-major MLP tile: oT = w2 @ relu(w1 @ xT + b1) + b2.

    Shapes inside the kernel:
      xT_ref: (10, TILE_B)   w1_ref: (5, 10)   b1_ref: (5, 1)
      w2_ref: (2, 5)         b2_ref: (2, 1)    oT_ref: (2, TILE_B)
    """
    xT = xT_ref[...]
    h = jnp.dot(w1_ref[...], xT, preferred_element_type=jnp.float32)   # (5, TB)
    h = jnp.maximum(h + b1_ref[...], 0.0)                              # ReLU
    out = jnp.dot(w2_ref[...], h, preferred_element_type=jnp.float32)  # (2, TB)
    oT_ref[...] = (out + b2_ref[...]).astype(oT_ref.dtype)


def _pallas_forward_t(xT, w1, b1c, w2, b2c, *, tile_b):
    """Core Pallas call on feature-major data. xT: (10, B) -> (2, B)."""
    f_in, batch = xT.shape
    f_hid, f_out = w1.shape[0], w2.shape[0]

    if batch <= tile_b:
        # Single tile == full lane extent (exempt from the 128 divisibility rule).
        tb = batch
        xT_p = xT
        padded_b = batch
    else:
        tb = tile_b  # multiple of 128
        pad = (-batch) % tb
        xT_p = jnp.pad(xT, ((0, 0), (0, pad))) if pad else xT
        padded_b = batch + pad

    grid = (pl.cdiv(padded_b, tb),)

    outT_p = pl.pallas_call(
        mlp_kernel_t,
        out_shape=jax.ShapeDtypeStruct((f_out, padded_b), jnp.float32),
        grid=grid,
        in_specs=[
            # x tiles stream over the batch (lane) axis.
            pl.BlockSpec((f_in, tb), lambda i: (0, i)),
            # Weights / biases: constant index_map -> stay VMEM-resident.
            pl.BlockSpec((f_hid, f_in), lambda i: (0, 0)),
            pl.BlockSpec((f_hid, 1), lambda i: (0, 0)),
            pl.BlockSpec((f_out, f_hid), lambda i: (0, 0)),
            pl.BlockSpec((f_out, 1), lambda i: (0, 0)),
        ],
        out_specs=pl.BlockSpec((f_out, tb), lambda i: (0, i)),
        compiler_params=pltpu.CompilerParams(
            dimension_semantics=("parallel",),  # shard batch tiles across TCs (v7x)
        ),
    )(xT_p, w1, b1c, w2, b2c)

    return outT_p[:, :batch]


@functools.partial(jax.jit, static_argnames=("tile_b", "force_pallas"))
def net_forward(x, w1, b1, w2, b2, *, tile_b=DEFAULT_TILE_B, force_pallas=False):
    """Forward pass matching `Net.forward`.

    x:  (B, 10) float32
    w1: (5, 10) float32  (PyTorch fc1.weight layout: out_features x in_features)
    b1: (5,)    float32
    w2: (2, 5)  float32
    b2: (2,)    float32
    returns (B, 2) float32
    """
    batch = x.shape[0]

    if not force_pallas and batch < MIN_ALLAS_BATCH if False else False:
        pass  # placeholder (never taken) -- real dispatch below

    if not force_pallas and batch < MIN_PALLAS_BATCH:
        # Tiny-batch fast path: kernel launch overhead would dominate.
        return jnp.maximum(x @ w1.T + b1, 0.0) @ w2.T + b2

    # Layout plumbing: present feature-major (lane-dense) data to the kernel.
    # (Callers that can natively produce (10, B) data should call
    # _pallas_forward_t directly and skip both transposes.)
    xT = x.T                                      # (10, B)
    outT = _pallas_forward_t(
        xT, w1, b1.reshape(-1, 1), w2, b2.reshape(-1, 1), tile_b=tile_b
    )                                             # (2, B)
    return outT.T                                 # (B, 2)


def init_params(key):
    """Deterministic init mimicking nn.Linear's uniform(-1/sqrt(fan_in), +).

    Weights kept in PyTorch layout (out_features, in_features)."""
    k1, k2, k3, k4 = jax.random.split(key, 4)
    bound1 = 1.0 / jnp.sqrt(10.0)
    bound2 = 1.0 / jnp.sqrt(5.0)
    w1 = jax.random.uniform(k1, (5, 10), jnp.float32, -bound1, bound1)
    b1 = jax.random.uniform(k2, (5,), jnp.float32, -bound1, bound1)
    w2 = jax.random.uniform(k3, (2, 5), jnp.float32, -bound2, bound2)
    b2 = jax.random.uniform(k4, (2,), jnp.float32, -bound2, bound2)
    return w1, b1, w2, b2


def _reference(x, w1, b1, w2, b2):
    return jnp.maximum(x @ w1.T + b1, 0.0) @ w2.T + b2


if __name__ == "__main__":
    key = jax.random.PRNGKey(0)
    kx1, kx2, kp = jax.random.split(key, 3)
    w1, b1, w2, b2 = init_params(kp)

    # --- Check 1: tiny batch, force the Pallas path (single tile, grid=1). ---
    B1 = 8
    x1 = jax.random.normal(kx1, (B1, 10), jnp.float32)
    out1 = jax.block_until_ready(
        net_forward(x1, w1, b1, w2, b2, force_pallas=True)
    )
    ref1 = _reference(x1, w1, b1, w2, b2)
    assert out1.shape == (B1, 2)
    assert jnp.allclose(out1, ref1, atol=1e-5, rtol=1e-5)

    # --- Check 2: multi-tile grid path with padding (tile_b=128, B=260 -> 3 tiles). ---
    B2 = 260
    x2 = jax.random.normal(kx2, (B2, 10), jnp.float32)
    out2 = jax.block_until_ready(
        net_forward(x2, w1, b1, w2, b2, tile_b=128, force_pallas=True)
    )
    ref2 = _reference(x2, w1, b1, w2, b2)
    assert out2.shape == (B2, 2)
    assert jnp.allclose(out2, ref2, atol=1e-5, rtol=1e-5)

    print("KERNEL_OK")
</pallas_src>

<mosaic_0001>
module attributes {stable_mosaic.version = 11 : i64} {
  func.func @mlp_kernel_t(%arg0: i32, %arg1: memref<10x8xf32, #tpu.memory_space<vmem>>, %arg2: memref<5x10xf32, #tpu.memory_space<vmem>>, %arg3: memref<5x1xf32, #tpu.memory_space<vmem>>, %arg4: memref<2x5xf32, #tpu.memory_space<vmem>>, %arg5: memref<2x1xf32, #tpu.memory_space<vmem>>, %arg6: memref<2x8xf32, #tpu.memory_space<vmem>>) attributes {dimension_semantics = [#tpu.dimension_semantics<parallel>], iteration_bounds = array<i64: 1>, scalar_prefetch = 0 : i64, scratch_operands = 0 : i64, tpu.core_type = #tpu.core_type<tc>, window_params = [{transform_indices = @transform_0, window_bounds = array<i64: 10, 8>}, {pipeline_mode = #tpu.pipeline_mode<synchronous>, transform_indices = @transform_1, window_bounds = array<i64: 5, 10>}, {pipeline_mode = #tpu.pipeline_mode<synchronous>, transform_indices = @transform_2, window_bounds = array<i64: 5, 1>}, {pipeline_mode = #tpu.pipeline_mode<synchronous>, transform_indices = @transform_3, window_bounds = array<i64: 2, 5>}, {pipeline_mode = #tpu.pipeline_mode<synchronous>, transform_indices = @transform_4, window_bounds = array<i64: 2, 1>}, {transform_indices = @transform_5, window_bounds = array<i64: 2, 8>}]} {
    %c0 = arith.constant 0 : index
    %c0_0 = arith.constant 0 : index
    %0 = vector.load %arg1[%c0, %c0_0] : memref<10x8xf32, #tpu.memory_space<vmem>>, vector<10x8xf32>
    %c0_1 = arith.constant 0 : index
    %c0_2 = arith.constant 0 : index
    %1 = vector.load %arg2[%c0_1, %c0_2] : memref<5x10xf32, #tpu.memory_space<vmem>>, vector<5x10xf32>
    %cst = arith.constant dense<0.000000e+00> : vector<5x8xf32>
    %2 = tpu.matmul %1, %0, %cst {dimension_numbers = #tpu.dot_dimension_numbers<[1], [0], [0], [1], [0, 0, 1, 1], [], []>} : vector<5x10xf32>, vector<10x8xf32>, vector<5x8xf32> -> vector<5x8xf32>
    %c0_3 = arith.constant 0 : index
    %c0_4 = arith.constant 0 : index
    %3 = vector.load %arg3[%c0_3, %c0_4] : memref<5x1xf32, #tpu.memory_space<vmem>>, vector<5x1xf32>
    %4 = vector.broadcast %3 : vector<5x1xf32> to vector<5x8xf32>
    %5 = arith.addf %2, %4 : vector<5x8xf32>
    %cst_5 = arith.constant 0.000000e+00 : f32
    %6 = vector.broadcast %cst_5 : f32 to vector<5x8xf32>
    %7 = arith.maximumf %5, %6 : vector<5x8xf32>
    %c0_6 = arith.constant 0 : index
    %c0_7 = arith.constant 0 : index
    %8 = vector.load %arg4[%c0_6, %c0_7] : memref<2x5xf32, #tpu.memory_space<vmem>>, vector<2x5xf32>
    %cst_8 = arith.constant dense<0.000000e+00> : vector<2x8xf32>
    %9 = tpu.matmul %8, %7, %cst_8 {dimension_numbers = #tpu.dot_dimension_numbers<[1], [0], [0], [1], [0, 0, 1, 1], [], []>} : vector<2x5xf32>, vector<5x8xf32>, vector<2x8xf32> -> vector<2x8xf32>
    %c0_9 = arith.constant 0 : index
    %c0_10 = arith.constant 0 : index
    %10 = vector.load %arg5[%c0_9, %c0_10] : memref<2x1xf32, #tpu.memory_space<vmem>>, vector<2x1xf32>
    %11 = vector.broadcast %10 : vector<2x1xf32> to vector<2x8xf32>
    %12 = arith.addf %9, %11 : vector<2x8xf32>
    %c0_11 = arith.constant 0 : index
    %c0_12 = arith.constant 0 : index
    %13 = vector.load %arg6[%c0_11, %c0_12] : memref<2x8xf32, #tpu.memory_space<vmem>>, vector<2x8xf32>
    tpu.vector_store %arg6[%c0_11, %c0_12], %12 {strides = array<i32>} : memref<2x8xf32, #tpu.memory_space<vmem>>, vector<2x8xf32>,
    return
  }
  func.func @transform_0(%arg0: i32) -> (i32, i32) {
    %c0_i32 = arith.constant 0 : i32
    %c0_i32_0 = arith.constant 0 : i32
    return %c0_i32, %arg0 : i32, i32
  }
  func.func @transform_1(%arg0: i32) -> (i32, i32) {
    %c0_i32 = arith.constant 0 : i32
    %c0_i32_0 = arith.constant 0 : i32
    %c0_i32_1 = arith.constant 0 : i32
    return %c0_i32, %c0_i32_0 : i32, i32
  }
  func.func @transform_2(%arg0: i32) -> (i32, i32) {
    %c0_i32 = arith.constant 0 : i32
    %c0_i32_0 = arith.constant 0 : i32
    %c0_i32_1 = arith.constant 0 : i32
    return %c0_i32, %c0_i32_0 : i32, i32
  }
  func.func @transform_3(%arg0: i32) -> (i32, i32) {
    %c0_i32 = arith.constant 0 : i32
    %c0_i32_0 = arith.constant 0 : i32
    %c0_i32_1 = arith.constant 0 : i32
    return %c0_i32, %c0_i32_0 : i32, i32
  }
  func.func @transform_4(%arg0: i32) -> (i32, i32) {
    %c0_i32 = arith.constant 0 : i32
    %c0_i32_0 = arith.constant 0 : i32
    %c0_i32_1 = arith.constant 0 : i32
    return %c0_i32, %c0_i32_0 : i32, i32
  }
  func.func @transform_5(%arg0: i32) -> (i32, i32) {
    %c0_i32 = arith.constant 0 : i32
    %c0_i32_0 = arith.constant 0 : i32
    return %c0_i32, %arg0 : i32, i32
  }
}

</mosaic_0001>

<bundles_post_ra>
// kernel: net_forward.1
= control target key start
LH: loop header
LB: loop body
LE: loop exit
PB: predicated region body
PF: predicated region fallthrough
CT: control target
= control target key end

     0   :  { %vm34_vm0 = vcmask 1041408   ;;  %v266_v2 = vmov 0.0|0.0   ;;  %vm267_vm1 = vmmov 1   ;;  %vm268_vm3 = vmmov 0   ;;  %s332_s0 = inlined_call_operand.vmem [shape: f32[10,8], index: 0, kind: input, shape index: {}]   ;;  %s333_s1 = inlined_call_operand.vmem [shape: f32[5,10], index: 1, kind: input, shape index: {}]   ;;  %s334_s2 = inlined_call_operand.vmem [shape: f32[5,1], index: 2, kind: input, shape index: {}]   ;;  %s335_s3 = inlined_call_operand.vmem [shape: f32[2,5], index: 3, kind: input, shape index: {}]   ;;  %s336_s4 = inlined_call_operand.vmem [shape: f32[2,1], index: 4, kind: input, shape index: {}]   ;;  %s337_s5 = inlined_call_operand.hbm [shape: f32[2,8], index: 5, kind: output, shape index: {}]  }
   0x1   :  { %v21_v0 = vld [vmem:[%s332_s0] sm:$0xff]  ;;  %v22_v1 = vld [vmem:[%s332_s0 + $0x8] sm:$0x3]  ;;  %231 = vmatprep.subr.bf16.mxu0 %v266_v2  ;;  %vm233_vm2 = vmpackc.low %vm34_vm0, %vm267_vm1  ;;  %v269_v4 = vmov 0.0   ;;  %vm30_vm4 = vcmask 80896   ;;  %v270_v7 = vmov 0  }
   0x2   :  { %v232_v3 = vpack.c.bf16 %v22_v1, %v21_v0  ;;  %223 = vmatprep.mubr.msk.f32.mxu0 %vm268_vm3, %v269_v4  ;;  %v24_v5 = vld [vmem:[%s334_s2] sm:$0x1f]  ;;  %226 = vmatprep.subr.mxu1 %v269_v4 }
   0x3   :  { %v23_v6 = vld [vmem:[%s333_s1] sm:$0x1f]  ;;  %241 = vset.pattern.permute.xlu0 %v270_v7 }
   0x4   :  { %234 = vmatpush3.bf16.msk.msra.mxu0 %vm233_vm2, %v232_v3 }
   0x5   :  { %10 = vsyncpa [#allocation3], 0  ;;  %27 = vperm.xlu0 %241, %v24_v5   ;;  %228 = vmatprep.mubr.msk.f32.mxu1 %vm268_vm3, %v269_v4  ;;  %v110_v8 = vld [vmem:[%s336_s4] sm:$0x3]  ;;  %vm120_vm5 = vcmask 1044480   ;;  %vm116_vm6 = vcmask 39936  }
   0x6   :  { %v109_v14 = vld [vmem:[%s335_s3] sm:$0x3]  ;;  %s271_s27 = smov [#allocation2]   ;;  %vm194_vm7 = vcmask 58368  }
   0x7   :  { %224 = vmatmul.mubr.msk.f32.vlgmr.msra.gmra.mrb[0].mxu0 %vm30_vm4, %v23_v6  ;;  %s202_s28 = sshll.u32 %s271_s27, 4  ;;  %s203_s28 = int_to_ptr.vmem [resolvable:$true] %s202_s28 }
   0x8   :  { %s242_s4 = scalar_lea.vmem %s203_s28, 32  ;;  %p247_p1 = scmp.lt.s32.totalorder %s203_s28, %s203_s28 }
   0x9   :  { %113 = vperm.xlu0 %241, %v110_v8   ;;  %p243_p0 = scmp.ne.s32.totalorder %s203_s28, %s242_s4  ;;  %p248_p2 = scmp.lt.s32.totalorder %s242_s4, %s242_s4 }
   0xb   :  { %p249_p3 = por %p248_p2, %p247_p1 }
   0xd   :  { %p250_p4 = pnand %p249_p3, %p243_p0 }
  0x84   :  { %v28_v9 = vpop.permute.xlu0 %27 }
  0x88   :  { %v114_v15 = vpop.permute.xlu0 %113 }
  0xda   :  { %v104_v10 = vpop.f32.mrb[0].mxu0 }
  0xdb   :  { %v105_v11 = vadd.f32 %v104_v10, %v28_v9  ;;  %v225_v12 = vpop.f32.mrb[1].mxu0 }
  0xdd   :  { %v108_v13 = vmax.f32 %v105_v11, 0.0 }
  0xdf   :  { %227 = vmatpush3.msk.msra.mxu1 %vm120_vm5, %v108_v13 }
  0xe0   :  { %229 = vmatmul.mubr.msk.f32.vlgmr.msra.gmra.mrb[0].mxu1 %vm116_vm6, %v109_v14 }
 0x1b3   :  { %v190_v16 = vpop.f32.mrb[0].mxu1 }
 0x1b4   :  { %v191_v17 = vadd.f32 %v190_v16, %v114_v15  ;;  %v230_v18 = vpop.f32.mrb[1].mxu1 }
 0x1b6   :  { %195 = vst.msk [vmem:[#allocation2] sm:$0x3] %vm194_vm7, %v191_v17 }
 0x1b7   :  { %253 = shalt.err (!%p250_p4)
}
 0x1b8   :  { %s254_s30 = scalar_lea.hbm %s337_s5, 32 }
 0x1b9   :  { %p255_p5 = scmp.ne.s32.totalorder %s337_s5, %s254_s30  ;;  %p258_p6 = scmp.lt.u32.totalorder %s254_s30, %s337_s5 }
 0x1bb   :  { %p260_p7 = pnand %p258_p6, %p255_p5 }
 0x1bd   :  { %263 = shalt.err (!%p260_p7)
}
 0x1be   :  { %205 = dma.vmem_to_hbm [thread:$0]  %s203_s28, 32, %s337_s5, [#allocation3]  }
 0x1bf   :  { %264 = dma.done.wait [#allocation3], 32  }
 0x1c0   :  { %265 = vsyncadd [#allocation3], 4294967264 }
 0x1c1   :  { %209 = vsyncpa [#allocation3], 1 }

</bundles_post_ra>
